<compile_context>
chip_gen: v7x
topology: tpu7x:2x2x1
jax: 0.10.0
libtpu: 0.0.40
codegen_flags: <defaults>
</compile_context>

<pallas_src>
import jax
import jax.numpy as jnp
from jax.experimental import pallas as pl
from jax.experimental.pallas import tpu as pltpu


def amf_l_kernel(x_ref, r_ref, w1t_ref, b1_ref, w2t_ref, b2_ref, o_ref):
    # x_ref, r_ref, o_ref : (1, C, t_hw)   (spatial on the lane axis)
    # w1t_ref : (Cmid, C), b1_ref : (Cmid, 1)
    # w2t_ref : (C, Cmid), b2_ref : (C, 1)
    xa = x_ref[0] + r_ref[0]                                   # (C, t_hw) f32

    # Conv1x1 (C -> Cmid) + folded BN1, then ReLU.  Contract over channels.
    h = jnp.dot(w1t_ref[...], xa, preferred_element_type=jnp.float32)
    h = jnp.maximum(h + b1_ref[...], 0.0)                      # (Cmid, t_hw)

    # Conv1x1 (Cmid -> C) + folded BN2.
    y = jnp.dot(w2t_ref[...], h, preferred_element_type=jnp.float32)
    y = y + b2_ref[...]                                        # (C, t_hw)

    # Sigmoid gate applied to the summed input (f32 throughout).
    o_ref[0] = xa * jax.nn.sigmoid(y)


def _pick_spatial_tile(hw, target=2048):
    """Largest multiple of 128 that divides hw and is <= target; else full hw."""
    if hw % 128 != 0:
        return hw  # full-extent block (allowed when equal to the array dim)
    best = 128
    d = 128
    cap = min(hw, target)
    while d <= cap:
        if hw % d == 0:
            best = d
        d += 128
    return best


def amf_l_forward(x_nchw, res_nchw, w1, b1, w2, b2, *, t_hw=None):
    """x_nchw, res_nchw: (N, C, H, W) f32. w1:(C,Cmid) b1:(Cmid,) w2:(Cmid,C) b2:(C,)."""
    N, C, H, W = x_nchw.shape
    Cmid = w1.shape[1]
    HW = H * W

    # NCHW -> (N, C, H*W): a pure reshape, no data movement.
    x3 = x_nchw.reshape(N, C, HW)
    r3 = res_nchw.reshape(N, C, HW)

    if t_hw is None:
        t_hw = _pick_spatial_tile(HW)
    assert HW % t_hw == 0, "t_hw must divide H*W"

    # Tiny (<=16 KiB) weight reorganisation on the host.
    w1t = jnp.asarray(w1).T            # (Cmid, C)
    w2t = jnp.asarray(w2).T            # (C, Cmid)
    b1c = jnp.asarray(b1).reshape(Cmid, 1)
    b2c = jnp.asarray(b2).reshape(C, 1)

    M = N * HW
    cost = pl.CostEstimate(
        flops=4 * M * C * Cmid + 5 * M * C,
        transcendentals=M * C,                       # sigmoid exp
        bytes_accessed=3 * M * C * 4 + (2 * C * Cmid + C + Cmid) * 4,
    )

    out3 = pl.pallas_call(
        amf_l_kernel,
        out_shape=jax.ShapeDtypeStruct((N, C, HW), jnp.float32),
        grid_spec=pltpu.PrefetchScalarGridSpec(
            num_scalar_prefetch=0,
            grid=(N, HW // t_hw),
            in_specs=[
                pl.BlockSpec((1, C, t_hw), lambda n, s: (n, 0, s)),   # x
                pl.BlockSpec((1, C, t_hw), lambda n, s: (n, 0, s)),   # residual
                pl.BlockSpec((Cmid, C), lambda n, s: (0, 0)),         # W1^T (BN1 folded)
                pl.BlockSpec((Cmid, 1), lambda n, s: (0, 0)),         # b1
                pl.BlockSpec((C, Cmid), lambda n, s: (0, 0)),         # W2^T (BN2 folded)
                pl.BlockSpec((C, 1), lambda n, s: (0, 0)),            # b2
            ],
            out_specs=pl.BlockSpec((1, C, t_hw), lambda n, s: (n, 0, s)),
        ),
        compiler_params=pltpu.CompilerParams(
            dimension_semantics=("parallel", "parallel")),
        cost_estimate=cost,
    )(x3, r3, w1t, b1c, w2t, b2c)

    # (N, C, H*W) -> (N, C, H, W): again a free reshape.
    return out3.reshape(N, C, H, W)


def fold_bn(conv_w, conv_b, gamma, beta, mean, var, eps=1e-5):
    """Fold eval-mode BatchNorm into a 1x1-conv weight/bias.

    conv_w: (Cin, Cout) matmul weight, conv_b: (Cout,).
    Returns folded (Cin, Cout), (Cout,).
    """
    scale = gamma / jnp.sqrt(var + eps)          # (Cout,)
    w_f = conv_w * scale[None, :]
    b_f = (conv_b - mean) * scale + beta
    return w_f, b_f


def make_params(channels=64, r=2, seed=0):
    inter = channels // r
    key = jax.random.PRNGKey(seed)
    k1, k2, k3, k4 = jax.random.split(key, 4)

    # Conv2d(channels, inter, 1) weights: PyTorch (out,in,1,1) -> matmul (in,out)
    w1 = jax.random.normal(k1, (channels, inter), jnp.float32) * 0.05
    c1b = jax.random.normal(k2, (inter,), jnp.float32) * 0.05
    # Conv2d(inter, channels, 1)
    w2 = jax.random.normal(k3, (inter, channels), jnp.float32) * 0.05
    c2b = jax.random.normal(k4, (channels,), jnp.float32) * 0.05

    # BatchNorm params: deterministic non-trivial values.
    g1 = 1.0 + 0.01 * jnp.arange(inter, dtype=jnp.float32)
    be1 = 0.02 * jnp.arange(inter, dtype=jnp.float32)
    m1 = jnp.zeros((inter,), jnp.float32)
    v1 = jnp.ones((inter,), jnp.float32)

    g2 = 1.0 - 0.005 * jnp.arange(channels, dtype=jnp.float32)
    be2 = 0.01 * jnp.arange(channels, dtype=jnp.float32)
    m2 = jnp.zeros((channels,), jnp.float32)
    v2 = jnp.ones((channels,), jnp.float32)

    w1f, b1f = fold_bn(w1, c1b, g1, be1, m1, v1)
    w2f, b2f = fold_bn(w2, c2b, g2, be2, m2, v2)
    return w1f, b1f, w2f, b2f


def reference_forward(x, res, w1, b1, w2, b2):
    """Pure-JAX reference in NCHW (1x1 convs as channel matmuls)."""
    xa = x + res                                                   # (N, C, H, W)
    h = jnp.einsum('nchw,cd->ndhw', xa, w1) + b1[None, :, None, None]
    h = jnp.maximum(h, 0.0)
    y = jnp.einsum('ndhw,dc->nchw', h, w2) + b2[None, :, None, None]
    return xa * jax.nn.sigmoid(y)


if __name__ == "__main__":
    channels, r = 64, 2
    N, H, W = 2, 16, 16

    key = jax.random.PRNGKey(0)
    kx, kr = jax.random.split(key)
    x = jax.random.normal(kx, (N, channels, H, W), jnp.float32)
    residual = jax.random.normal(kr, (N, channels, H, W), jnp.float32)

    w1, b1, w2, b2 = make_params(channels, r, seed=0)

    out = amf_l_forward(x, residual, w1, b1, w2, b2)
    out = jax.block_until_ready(out)

    ref = reference_forward(x, residual, w1, b1, w2, b2)
    assert out.shape == (N, channels, H, W)
    assert jnp.allclose(out, ref, atol=1e-4, rtol=1e-4), "mismatch vs reference"

    print("KERNEL_OK")
</pallas_src>

<mosaic_0001>
module attributes {stable_mosaic.version = 11 : i64} {
  func.func @amf_l_kernel(%arg0: i32, %arg1: i32, %arg2: memref<1x64x256xf32, #tpu.memory_space<vmem>>, %arg3: memref<1x64x256xf32, #tpu.memory_space<vmem>>, %arg4: memref<32x64xf32, #tpu.memory_space<vmem>>, %arg5: memref<32x1xf32, #tpu.memory_space<vmem>>, %arg6: memref<64x32xf32, #tpu.memory_space<vmem>>, %arg7: memref<64x1xf32, #tpu.memory_space<vmem>>, %arg8: memref<1x64x256xf32, #tpu.memory_space<vmem>>) attributes {dimension_semantics = [#tpu.dimension_semantics<parallel>, #tpu.dimension_semantics<parallel>], iteration_bounds = array<i64: 2, 1>, scalar_prefetch = 0 : i64, scratch_operands = 0 : i64, tpu.core_type = #tpu.core_type<tc>, window_params = [{transform_indices = @transform_0, window_bounds = array<i64: 1, 64, 256>}, {transform_indices = @transform_1, window_bounds = array<i64: 1, 64, 256>}, {pipeline_mode = #tpu.pipeline_mode<synchronous>, transform_indices = @transform_2, window_bounds = array<i64: 32, 64>}, {pipeline_mode = #tpu.pipeline_mode<synchronous>, transform_indices = @transform_3, window_bounds = array<i64: 32, 1>}, {pipeline_mode = #tpu.pipeline_mode<synchronous>, transform_indices = @transform_4, window_bounds = array<i64: 64, 32>}, {pipeline_mode = #tpu.pipeline_mode<synchronous>, transform_indices = @transform_5, window_bounds = array<i64: 64, 1>}, {transform_indices = @transform_6, window_bounds = array<i64: 1, 64, 256>}]} {
    %c0 = arith.constant 0 : index
    %c0_0 = arith.constant 0 : index
    %c0_1 = arith.constant 0 : index
    %0 = vector.load %arg2[%c0, %c0_0, %c0_1] : memref<1x64x256xf32, #tpu.memory_space<vmem>>, vector<1x64x256xf32>
    %1 = vector.shape_cast %0 : vector<1x64x256xf32> to vector<64x256xf32>
    %c0_2 = arith.constant 0 : index
    %c0_3 = arith.constant 0 : index
    %c0_4 = arith.constant 0 : index
    %2 = vector.load %arg3[%c0_2, %c0_3, %c0_4] : memref<1x64x256xf32, #tpu.memory_space<vmem>>, vector<1x64x256xf32>
    %3 = vector.shape_cast %2 : vector<1x64x256xf32> to vector<64x256xf32>
    %4 = arith.addf %1, %3 : vector<64x256xf32>
    %c0_5 = arith.constant 0 : index
    %c0_6 = arith.constant 0 : index
    %5 = vector.load %arg4[%c0_5, %c0_6] : memref<32x64xf32, #tpu.memory_space<vmem>>, vector<32x64xf32>
    %cst = arith.constant dense<0.000000e+00> : vector<32x256xf32>
    %6 = tpu.matmul %5, %4, %cst {dimension_numbers = #tpu.dot_dimension_numbers<[1], [0], [0], [1], [0, 0, 1, 1], [], []>} : vector<32x64xf32>, vector<64x256xf32>, vector<32x256xf32> -> vector<32x256xf32>
    %c0_7 = arith.constant 0 : index
    %c0_8 = arith.constant 0 : index
    %7 = vector.load %arg5[%c0_7, %c0_8] : memref<32x1xf32, #tpu.memory_space<vmem>>, vector<32x1xf32>
    %8 = vector.broadcast %7 : vector<32x1xf32> to vector<32x256xf32>
    %9 = arith.addf %6, %8 : vector<32x256xf32>
    %cst_9 = arith.constant 0.000000e+00 : f32
    %10 = vector.broadcast %cst_9 : f32 to vector<32x256xf32>
    %11 = arith.maximumf %9, %10 : vector<32x256xf32>
    %c0_10 = arith.constant 0 : index
    %c0_11 = arith.constant 0 : index
    %12 = vector.load %arg6[%c0_10, %c0_11] : memref<64x32xf32, #tpu.memory_space<vmem>>, vector<64x32xf32>
    %cst_12 = arith.constant dense<0.000000e+00> : vector<64x256xf32>
    %13 = tpu.matmul %12, %11, %cst_12 {dimension_numbers = #tpu.dot_dimension_numbers<[1], [0], [0], [1], [0, 0, 1, 1], [], []>} : vector<64x32xf32>, vector<32x256xf32>, vector<64x256xf32> -> vector<64x256xf32>
    %c0_13 = arith.constant 0 : index
    %c0_14 = arith.constant 0 : index
    %14 = vector.load %arg7[%c0_13, %c0_14] : memref<64x1xf32, #tpu.memory_space<vmem>>, vector<64x1xf32>
    %15 = vector.broadcast %14 : vector<64x1xf32> to vector<64x256xf32>
    %16 = arith.addf %13, %15 : vector<64x256xf32>
    %17 = arith.negf %16 : vector<64x256xf32>
    %18 = math.exp %17 : vector<64x256xf32>
    %cst_15 = arith.constant 1.000000e+00 : f32
    %19 = vector.broadcast %cst_15 : f32 to vector<64x256xf32>
    %20 = arith.addf %19, %18 : vector<64x256xf32>
    %21 = arith.divf %19, %20 : vector<64x256xf32>
    %22 = arith.mulf %4, %21 : vector<64x256xf32>
    %c0_16 = arith.constant 0 : index
    %c0_17 = arith.constant 0 : index
    %c0_18 = arith.constant 0 : index
    %23 = vector.load %arg8[%c0_16, %c0_17, %c0_18] : memref<1x64x256xf32, #tpu.memory_space<vmem>>, vector<1x64x256xf32>
    %24 = vector.shape_cast %23 : vector<1x64x256xf32> to vector<64x256xf32>
    %25 = vector.shape_cast %22 : vector<64x256xf32> to vector<1x64x256xf32>
    tpu.vector_store %arg8[%c0_16, %c0_17, %c0_18], %25 {strides = array<i32>} : memref<1x64x256xf32, #tpu.memory_space<vmem>>, vector<1x64x256xf32>,
    return
  }
  func.func @transform_0(%arg0: i32, %arg1: i32) -> (i32, i32, i32) {
    %c0_i32 = arith.constant 0 : i32
    %c0_i32_0 = arith.constant 0 : i32
    return %arg0, %c0_i32, %arg1 : i32, i32, i32
  }
  func.func @transform_1(%arg0: i32, %arg1: i32) -> (i32, i32, i32) {
    %c0_i32 = arith.constant 0 : i32
    %c0_i32_0 = arith.constant 0 : i32
    return %arg0, %c0_i32, %arg1 : i32, i32, i32
  }
  func.func @transform_2(%arg0: i32, %arg1: i32) -> (i32, i32) {
    %c0_i32 = arith.constant 0 : i32
    %c0_i32_0 = arith.constant 0 : i32
    %c0_i32_1 = arith.constant 0 : i32
    return %c0_i32, %c0_i32_0 : i32, i32
  }
  func.func @transform_3(%arg0: i32, %arg1: i32) -> (i32, i32) {
    %c0_i32 = arith.constant 0 : i32
    %c0_i32_0 = arith.constant 0 : i32
    %c0_i32_1 = arith.constant 0 : i32
    return %c0_i32, %c0_i32_0 : i32, i32
  }
  func.func @transform_4(%arg0: i32, %arg1: i32) -> (i32, i32) {
    %c0_i32 = arith.constant 0 : i32
    %c0_i32_0 = arith.constant 0 : i32
    %c0_i32_1 = arith.constant 0 : i32
    return %c0_i32, %c0_i32_0 : i32, i32
  }
  func.func @transform_5(%arg0: i32, %arg1: i32) -> (i32, i32) {
    %c0_i32 = arith.constant 0 : i32
    %c0_i32_0 = arith.constant 0 : i32
    %c0_i32_1 = arith.constant 0 : i32
    return %c0_i32, %c0_i32_0 : i32, i32
  }
  func.func @transform_6(%arg0: i32, %arg1: i32) -> (i32, i32, i32) {
    %c0_i32 = arith.constant 0 : i32
    %c0_i32_0 = arith.constant 0 : i32
    return %arg0, %c0_i32, %arg1 : i32, i32, i32
  }
}

</mosaic_0001>

<bundles_post_ra>
// kernel: tpu_custom_call.1
= control target key start
LH: loop header
LB: loop body
LE: loop exit
PB: predicated region body
PF: predicated region fallthrough
CT: control target
= control target key end

     0   :  { %s1837_s0 = inlined_call_operand.hbm [shape: f32[2,64,256], index: 0, kind: input, shape index: {}]   ;;  %s1838_s1 = inlined_call_operand.hbm [shape: f32[2,64,256], index: 1, kind: input, shape index: {}]   ;;  %s1839_s2 = inlined_call_operand.vmem [shape: f32[32,64], index: 2, kind: input, shape index: {}]   ;;  %s1840_s3 = inlined_call_operand.vmem [shape: f32[32,1], index: 3, kind: input, shape index: {}]   ;;  %s1841_s4 = inlined_call_operand.vmem [shape: f32[64,32], index: 4, kind: input, shape index: {}]   ;;  %s1842_s5 = inlined_call_operand.vmem [shape: f32[64,1], index: 5, kind: input, shape index: {}]   ;;  %s1843_s6 = inlined_call_operand.hbm [shape: f32[2,64,256], index: 6, kind: output, shape index: {}]  }
   0x1   :  { %1849 = sst [smem:[#allocation12_spill]] %s1837_s0 }
   0x2   :  { %11 = vsyncpa [#allocation3], 0 }
   0x3   :  { %13 = vsyncpa [#allocation3 + $0x1], 0 }
   0x4   :  { %14 = vsyncpa [#allocation6], 0 }
   0x5   :  { %16 = vsyncpa [#allocation6 + $0x1], 0 }
   0x6   :  { %17 = vsyncpa [#allocation4], 0 }
   0x7   :  { %19 = vsyncpa [#allocation4 + $0x1], 0  ;;  %s1381_s21 = smov 0   ;;  %s1383_s22 = smov 0  }
   0x8   :  { %s1385_s23 = smov 0   ;;  %s1387_s24 = smov 0  }
   0x9   :  { %s1389_s25 = smov 0   ;;  %s1391_s26 = smov 0  }
   0xa LB: > { %s972_s27 = sadd.s32 4294967295, %s1335_s26   ;;  %s973_s28 = sadd.s32 4294967294, %s1335_s26   ;;  %s1335_s26 = sphi %s1391_s26, %s25_s26   ;;  %s1331_s25 = sphi %s1389_s25, %s1870_s25   ;;  %s1327_s24 = sphi %s1387_s24, %s1869_s24   ;;  %s1323_s23 = sphi %s1385_s23, %s1868_s23   ;;  %s1319_s22 = sphi %s1383_s22, %s1867_s22   ;;  %s1315_s21 = sphi %s1381_s21, %s1866_s21  }
   0xb   : > { %s37_s29 = sadd.s32 1, %s1331_s25  ;;  %s46_s30 = sadd.s32 1, %s1323_s23 }
   0xc   : > { %p39_p0 = scmp.ge.s32.totalorder %s37_s29, 2  ;;  %p53_p1 = scmp.ne.s32.totalorder %s1323_s23, %s1319_s22 }
   0xd   : > { %p54_p2 = scmp.eq.s32.totalorder %s1335_s26, 0  ;;  %p59_p3 = scmp.ne.s32.totalorder %s1319_s22, %s1315_s21 }
   0xe   : > { %s1872_s29 = smov (%p39_p0, %s37_s29), 0  ;;  %p60_p5 = scmp.eq.s32.totalorder %s972_s27, 0 }
   0xf   : > { %1850 = sst [smem:[#allocation11_spill]] %s1872_s29  ;;  %p1422_p4 = por %p54_p2, %p53_p1 }
  0x10   : > { %s41_s8 = ssub.s32 %s1331_s25, %s1872_s29  ;;  %p197_p6 = scmp.eq.s32.totalorder %s972_s27, 1 }
  0x11   : > { %p44_p7 = scmp.eq.s32.totalorder %s41_s8, 0  ;;  %p1428_p8 = por %p60_p5, %p59_p3 }
  0x12   : > { %p1432_p9 = por %p197_p6, %p53_p1  ;;  %p203_p10 = scmp.eq.s32.totalorder %s973_s28, 1 }
  0x13   : > { %s1852_s9 = scalar_select %p1428_p8, 1, 0 }
  0x14   : > { %s1853_s10 = scalar_select %p1432_p9, 1, 0 }
  0x15   : > { %s1437_s11 = scalar_select %p44_p7, %s1323_s23, %s46_s30  }
  0x16   : > { %p1439_p11 = por %p203_p10, %p59_p3  ;;  %p1067_p13 = scmp.lt.s32.totalorder %s1335_s26, 2 }
  0x17   : > { %s1446_s13 = sand.u32 1, %s1323_s23   ;;  %s1019_s15 = sshll.u32 %s1331_s25, 11 }
  0x18   : > { %s1854_s12 = scalar_select %p1439_p11, 1, 0 }
  0x19   : > { %s1844_s14 = sshll.u32 %s1446_s13, 7  ;;  %s1855_s0 = sld [smem:[#allocation12_spill]] }
  0x1a   : > { %s239_s19 = scalar_lea.vmem [#allocation2], %s1844_s14  ;;  %p1463_p0 = pnand %p1067_p13, %p1422_p4 }
  0x1b   : > { %s248_s20 = sshll.u32 %s239_s19, 4  ;;  %s236_s28 = scalar_lea.sflag [#allocation3], %s1446_s13  ;;  %s1459_s20 = int_to_ptr.vmem [resolvable:$true] %s248_s20 }
  0x1c   : > { %p1191_p3 = pneg %p1463_p0 }
  0x1f   : > { %s1455_s18 = scalar_lea.hbm %s1855_s0, %s1019_s15  ;;  %s1194_s7 = scalar_lea.hbm %s1855_s0, 4096 }
  0x20   : > { %s1189_s30 = scalar_lea.hbm %s1455_s18, 2048  ;;  %p1195_p4 = scmp.lt.u32.totalorder %s1455_s18, %s1855_s0 }
  0x21   : > { %p1190_p2 = scmp.ne.s32.totalorder %s1455_s18, %s1189_s30  ;;  %p1196_p7 = scmp.lt.u32.totalorder %s1194_s7, %s1189_s30 }
  0x22   : > { %p1198_p13 = scmp.lt.u32.totalorder %s1189_s30, %s1455_s18 }
  0x23   : > { %p1192_p5 = pnand %p1191_p3, %p1190_p2  ;;  %p1197_p10 = por %p1196_p7, %p1195_p4 }
  0x25   : > { %p1193_p6 = pneg %p1192_p5  ;;  %p1199_p12 = por %p1198_p13, %p1197_p10 }
  0x27   : > { %p1200_p1 = pnand %p1199_p12, %p1193_p6 }
  0x29   : > { %1203 = shalt.err (!%p1200_p1)
}
  0x2a   : > { %s1204_s14 = scalar_lea.vmem %s1459_s20, 2048  ;;  %s1337_s8 = smov [#allocation2]  }
  0x2b   : > { %p1205_p2 = scmp.ne.s32.totalorder %s1459_s20, %s1204_s14  ;;  %s1209_s16 = sshll.u32 %s1337_s8, 4  ;;  %s1210_s16 = int_to_ptr.vmem [resolvable:$false] %s1209_s16 }
  0x2c   : > { %s1211_s17 = scalar_lea.vmem %s1210_s16, 4096  ;;  %p1212_p9 = scmp.lt.s32.totalorder %s1459_s20, %s1210_s16 }
  0x2d   : > { %p1207_p5 = pnand %p1205_p2, %p1191_p3  ;;  %p1213_p4 = scmp.lt.s32.totalorder %s1211_s17, %s1204_s14 }
  0x2f   : > { %p1208_p11 = pneg %p1207_p5  ;;  %p1214_p7 = por %p1213_p4, %p1212_p9 }
  0x31   : > { %p1215_p10 = pnand %p1214_p7, %p1208_p11 }
  0x33   : > { %1218 = shalt.err (!%p1215_p10)
}
  0x34   : > { %s1847_s30 = smov 256   ;;  %s1339_s7 = smov 16  }
  0x35   : > { %1059 = dma.hbm_to_vmem [thread:$0]  (!%p1463_p0), %s1455_s18, 2048, %s1459_s20, %s236_s28, %s1847_s30, %s1847_s30, %s1339_s7  }
  0x36   : > { %p279_p9 = scmp.lt.s32.totalorder %s1335_s26, 3  ;;  %s1505_s8 = scalar_lea.hbm %s1838_s1, %s1019_s15 }
  0x37   : > { %p1857_p11 = scmp.ge.s32.totalorder %s1335_s26, 1  ;;  %s1859_s17 = sshll.u32 %s1446_s13, 7 }
  0x38   : > { %s262_s0 = scalar_lea.vmem [#allocation5], %s1859_s17  ;;  %s259_s18 = scalar_lea.sflag [#allocation6], %s1446_s13 }
  0x39   : > { %p1509_p12 = pnand %p1857_p11, %p279_p9  ;;  %s271_s29 = sshll.u32 %s262_s0, 4  ;;  %s1515_s29 = int_to_ptr.vmem [resolvable:$true] %s271_s29 }
  0x3a   : > { %s1219_s20 = scalar_lea.hbm %s1505_s8, 2048  ;;  %s1224_s14 = scalar_lea.hbm %s1838_s1, 4096 }
  0x3b   : > { %p1220_p1 = scmp.ne.s32.totalorder %s1505_s8, %s1219_s20  ;;  %p1225_p2 = scmp.lt.u32.totalorder %s1505_s8, %s1838_s1 }
  0x3c   : > { %p1226_p5 = scmp.lt.u32.totalorder %s1224_s14, %s1219_s20  ;;  %p1228_p7 = scmp.lt.u32.totalorder %s1219_s20, %s1505_s8 }
  0x3d   : > { %p1222_p6 = pnand %p1220_p1, %p1191_p3 }
  0x3e   : > { %p1227_p4 = por %p1226_p5, %p1225_p2 }
  0x3f   : > { %p1223_p13 = pneg %p1222_p6 }
  0x40   : > { %p1229_p10 = por %p1228_p7, %p1227_p4 }
  0x42   : > { %p1230_p9 = pnand %p1229_p10, %p1223_p13 }
  0x44   : > { %1233 = shalt.err (!%p1230_p9)
}
  0x45   : > { %s1234_s0 = scalar_lea.vmem %s1515_s29, 2048  ;;  %s1340_s17 = smov [#allocation5]  }
  0x46   : > { %p1235_p11 = scmp.ne.s32.totalorder %s1515_s29, %s1234_s0  ;;  %s1239_s15 = sshll.u32 %s1340_s17, 4  ;;  %s1240_s15 = int_to_ptr.vmem [resolvable:$false] %s1239_s15 }
  0x47   : > { %s1241_s30 = scalar_lea.vmem %s1240_s15, 4096  ;;  %p1242_p8 = scmp.lt.s32.totalorder %s1515_s29, %s1240_s15 }
  0x48   : > { %p1237_p1 = pnand %p1235_p11, %p1191_p3  ;;  %p1243_p2 = scmp.lt.s32.totalorder %s1241_s30, %s1234_s0 }
  0x4a   : > { %p1238_p6 = pneg %p1237_p1  ;;  %p1244_p5 = por %p1243_p2, %p1242_p8 }
  0x4c   : > { %p1245_p4 = pnand %p1244_p5, %p1238_p6 }
  0x4e   : > { %1248 = shalt.err (!%p1245_p4)
}
  0x4f   : > { %s1860_s20 = smov 256   ;;  %283 = sbr.rel (%p1509_p12) target bundleno = 632 (0x278), region = 44 }
  0x50   : > { %1062 = dma.hbm_to_vmem [thread:$0]  (!%p1463_p0), %s1505_s8, 2048, %s1515_s29, %s259_s18, %s1860_s20, %s1860_s20, %s1339_s7  }
  0x51   : > { %s1549_s28 = sand.u32 (!%p1509_p12), 1, %s1319_s22   ;;  %p1861_p8 = scmp.ne.s32.totalorder (!%p1509_p12), %s1852_s9, 0 }
  0x52   : > { %s1552_s14 = sshll.u32 (!%p1509_p12), %s1549_s28, 7  ;;  %s286_s27 = scalar_lea.sflag (!%p1509_p12), [#allocation3], %s1549_s28 }
  0x53   : > { %s1556_s19 = scalar_lea.vmem (!%p1509_p12), [#allocation2], %s1552_s14 }
  0x56   : > { %1302 = dma.done.wait (%p1861_p8), %s286_s27, 2048  }
  0x57   : > { %1304 = vsyncadd (%p1861_p8), %s286_s27, 4294965248  ;;  %s295_s29 = scalar_lea.sflag [#allocation6], %s1549_s28  ;;  %s1564_s13 = scalar_lea.vmem [#allocation5], %s1552_s14 }
  0x58   : > { %1306 = dma.done.wait (%p1861_p8), %s295_s29, 2048  }
  0x59   : > { %1308 = vsyncadd (%p1861_p8), %s295_s29, 4294965248  ;;  %v1341_v0 = vmov 0.0   ;;  %v1342_v1 = vmov 0   ;;  %v336_v2 = vld [vmem:[%s1556_s19 + $0x8] sm:$0xff]  ;;  %v338_v3 = vld [vmem:[%s1556_s19 + $0x18] sm:$0xff]  ;;  %vm411_vm0 = vcmask 523264  }
  0x5a   : > { %488 = vmatprep.mubr.f32.mxu0 %v1341_v0  ;;  %1123 = vset.pattern.permute.xlu0 %v1342_v1  ;;  %v352_v4 = vld [vmem:[%s1564_s13 + $0x8] sm:$0xff]  ;;  %v354_v5 = vld [vmem:[%s1564_s13 + $0x18] sm:$0xff]  ;;  %v335_v7 = vld [vmem:[%s1556_s19] sm:$0xff]  ;;  %vm577_vm1 = vcmask 261120   ;;  %s1749_s17 = scalar_lea.vmem [#allocation7], %s1552_s14  ;;  %s1021_s14 = sshll.u32 %s1327_s24, 11 }
  0x5b   : > { %1124 = vset.pattern.permute.xlu1 %v1342_v1  ;;  %672 = vmatprep.mubr.f32.mxu1 %v1341_v0  ;;  %v1576_v6 = vadd.f32 %v352_v4, %v336_v2  ;;  %v337_v8 = vld [vmem:[%s1556_s19 + $0x10] sm:$0xff]  ;;  %v1580_v9 = vadd.f32 %v354_v5, %v338_v3  ;;  %v351_v10 = vld [vmem:[%s1564_s13] sm:$0xff]  ;;  %v340_v12 = vld [vmem:[%s1556_s19 + $0x28] sm:$0xff]  ;;  %s859_s15 = sshll.u32 %s1749_s17, 4  ;;  %s1782_s27 = scalar_lea.hbm %s1843_s6, %s1021_s14  ;;  %s1784_s15 = int_to_ptr.vmem [resolvable:$true] %s859_s15 }
  0x5c   : > { %v353_v11 = vld [vmem:[%s1564_s13 + $0x10] sm:$0xff]  ;;  %v1585_v13 = vadd.f32 %v351_v10, %v335_v7  ;;  %v342_v15 = vld [vmem:[%s1556_s19 + $0x38] sm:$0xff]  ;;  %v356_v16 = vld [vmem:[%s1564_s13 + $0x28] sm:$0xff]  ;;  %s844_s24 = scalar_lea.sflag [#allocation4], %s1549_s28  ;;  %p1862_p3 = scmp.ne.s32.totalorder %s1853_s10, 0 }
  0x5d   : > { %v1587_v14 = vadd.f32 %v353_v11, %v337_v8  ;;  %v358_v17 = vld [vmem:[%s1564_s13 + $0x38] sm:$0xff]  ;;  %v1022_v18 = vpack.c.bf16 %v1580_v9, %v1576_v6  ;;  %v1594_v19 = vadd.f32 %v356_v16, %v340_v12  ;;  %v339_v21 = vld [vmem:[%s1556_s19 + $0x20] sm:$0xff]  ;;  %v341_v22 = vld [vmem:[%s1556_s19 + $0x30] sm:$0xff]  ;;  %s1343_s29 = smov [#allocation7]  }
  0x5e   : > { %v1596_v20 = vadd.f32 %v358_v17, %v342_v15  ;;  %v355_v23 = vld [vmem:[%s1564_s13 + $0x20] sm:$0xff]  ;;  %v357_v25 = vld [vmem:[%s1564_s13 + $0x30] sm:$0xff]  ;;  %v344_v27 = vld [vmem:[%s1556_s19 + $0x48] sm:$0xff] }
  0x5f   : > { %v1024_v24 = vpack.c.bf16 %v1587_v14, %v1585_v13  ;;  %v1604_v26 = vadd.f32 %v355_v23, %v339_v21  ;;  %v346_v28 = vld [vmem:[%s1556_s19 + $0x58] sm:$0xff]  ;;  %1023 = vmatprep.subr.bf16.mxu0 %v1022_v18  ;;  %v1610_v30 = vadd.f32 %v357_v25, %v341_v22  ;;  %v360_v31 = vld [vmem:[%s1564_s13 + $0x48] sm:$0xff]  ;;  %v343_v33 = vld [vmem:[%s1556_s19 + $0x40] sm:$0xff] }
  0x60   : > { %v1026_v29 = vpack.c.bf16 %v1596_v20, %v1594_v19  ;;  %v362_v32 = vld [vmem:[%s1564_s13 + $0x58] sm:$0xff]  ;;  %v1615_v34 = vadd.f32 %v360_v31, %v344_v27  ;;  %v345_v36 = vld [vmem:[%s1556_s19 + $0x50] sm:$0xff]  ;;  %v359_v37 = vld [vmem:[%s1564_s13 + $0x40] sm:$0xff] }
  0x61   : > { %1025 = vmatpush1.bf16.msra.mxu0 %v1024_v24  ;;  %v1617_v35 = vadd.f32 %v362_v32, %v346_v28  ;;  %v361_v38 = vld [vmem:[%s1564_s13 + $0x50] sm:$0xff]  ;;  %v1028_v39 = vpack.c.bf16 %v1610_v30, %v1604_v26  ;;  %v1624_v40 = vadd.f32 %v359_v37, %v343_v33  ;;  %v348_v42 = vld [vmem:[%s1556_s19 + $0x68] sm:$0xff]  ;;  %v350_v43 = vld [vmem:[%s1556_s19 + $0x78] sm:$0xff] }
  0x62   : > { %1027 = vmatprep.subr.bf16.mxu0 %v1026_v29  ;;  %v1626_v41 = vadd.f32 %v361_v38, %v345_v36  ;;  %v364_v44 = vld [vmem:[%s1564_s13 + $0x68] sm:$0xff]  ;;  %v366_v46 = vld [vmem:[%s1564_s13 + $0x78] sm:$0xff]  ;;  %v347_v48 = vld [vmem:[%s1556_s19 + $0x60] sm:$0xff] }
  0x63   : > { %v1030_v45 = vpack.c.bf16 %v1617_v35, %v1615_v34  ;;  %v1634_v47 = vadd.f32 %v364_v44, %v348_v42  ;;  %v349_v49 = vld [vmem:[%s1556_s19 + $0x70] sm:$0xff]  ;;  %v1638_v50 = vadd.f32 %v366_v46, %v350_v43  ;;  %v363_v51 = vld [vmem:[%s1564_s13 + $0x60] sm:$0xff]  ;;  %v388_v59 = vld [vmem:[%s1840_s3 + $0x8] sm:$0xff]  ;;  %s1249_s19 = scalar_lea.vmem %s1784_s15, 2048 }
  0x64   : > { %v365_v52 = vld [vmem:[%s1564_s13 + $0x70] sm:$0xff]  ;;  %v1032_v53 = vpack.c.bf16 %v1626_v41, %v1624_v40  ;;  %v1644_v54 = vadd.f32 %v363_v51, %v347_v48  ;;  %v387_v57 = vld [vmem:[%s1840_s3] sm:$0xff]  ;;  %v390_v60 = vld [vmem:[%s1840_s3 + $0x18] sm:$0xff]  ;;  %p1250_p0 = scmp.ne.s32.totalorder %s1784_s15, %s1249_s19  ;;  %s1253_s13 = sshll.u32 %s1343_s29, 4  ;;  %s1254_s13 = int_to_ptr.vmem [resolvable:$false] %s1253_s13 }
  0x65   : > { %1029 = vmatpush1.bf16.msra.mxu0 %v1028_v39  ;;  %v1646_v55 = vadd.f32 %v365_v52, %v349_v49  ;;  %v1034_v56 = vpack.c.bf16 %v1638_v50, %v1634_v47  ;;  %v389_v58 = vld [vmem:[%s1840_s3 + $0x10] sm:$0xff]  ;;  %393 = vperm.xlu0 %1123, %v387_v57   ;;  %v529_v62 = vld [vmem:[%s1842_s5] sm:$0xff]  ;;  %v530_v63 = vld [vmem:[%s1842_s5 + $0x8] sm:$0xff]  ;;  %s1255_s9 = scalar_lea.vmem %s1254_s13, 4096  ;;  %p1256_p7 = scmp.lt.s32.totalorder %s1784_s15, %s1254_s13 }
  0x66   : > { %1031 = vmatprep.subr.bf16.mxu0 %v1030_v45  ;;  %403 = vperm.xlu1 %1124, %v389_v58   ;;  %v383_v1 = vld [vmem:[%s1839_s2] sm:$0xff]  ;;  %v531_v2 = vld [vmem:[%s1842_s5 + $0x10] sm:$0xff]  ;;  %v532_v3 = vld [vmem:[%s1842_s5 + $0x18] sm:$0xff]  ;;  %p1251_p12 = pnand %p1250_p0, %p1862_p3  ;;  %p1257_p10 = scmp.lt.s32.totalorder %s1255_s9, %s1249_s19 }
  0x67   : > { %v1036_v61 = vpack.c.bf16 %v1646_v55, %v1644_v54  ;;  %v384_v4 = vld [vmem:[%s1839_s2 + $0x8] sm:$0xff]  ;;  %v533_v5 = vld [vmem:[%s1842_s5 + $0x20] sm:$0xff]  ;;  %v385_v8 = vld [vmem:[%s1839_s2 + $0x10] sm:$0xff] }
  0x68   : > { %v534_v7 = vld [vmem:[%s1842_s5 + $0x28] sm:$0xff]  ;;  %v535_v10 = vld [vmem:[%s1842_s5 + $0x30] sm:$0xff]  ;;  %v536_v11 = vld [vmem:[%s1842_s5 + $0x38] sm:$0xff]  ;;  %p1252_p13 = pneg %p1251_p12  ;;  %p1258_p9 = por %p1257_p10, %p1256_p7 }
  0x69   : > { %1033 = vmatpush1.bf16.msra.mxu0 %v1032_v53  ;;  %398 = vperm.xlu0 %1123, %v388_v59   ;;  %v386_v12 = vld [vmem:[%s1839_s2 + $0x18] sm:$0xff]  ;;  %v521_v59 = vld [vmem:[%s1841_s4] sm:$0xff] }
  0x6a   : > { %1035 = vmatprep.subr.bf16.mxu0 %v1034_v56  ;;  %408 = vperm.xlu1 %1124, %v390_v60   ;;  %v522_v60 = vld [vmem:[%s1841_s4 + $0x8] sm:$0xff]  ;;  %p1259_p11 = pnand %p1258_p9, %p1252_p13 }
  0x6d   : > { %1037 = vmatpush1.bf16.msra.mxu0 %v1036_v61  ;;  %539 = vperm.xlu0 %1123, %v529_v62   ;;  %v523_v61 = vld [vmem:[%s1841_s4 + $0x10] sm:$0xff]  ;;  %v524_v62 = vld [vmem:[%s1841_s4 + $0x18] sm:$0xff] }
  0x6e   : > { %544 = vperm.xlu1 %1124, %v530_v63   ;;  %v525_v63 = vld [vmem:[%s1841_s4 + $0x20] sm:$0xff] }
  0x70   : > { %986 = vmatmul.mubr.msk.f32.vlgmr.msra.gmra.mrb[0].mxu0 %vm411_vm0, %v383_v1  ;;  %v526_v1 = vld [vmem:[%s1841_s4 + $0x28] sm:$0xff] }
  0x71   : > { %494 = vmatprep.mubr.f32.mxu0 %v1341_v0  ;;  %549 = vperm.xlu0 %1123, %v531_v2   ;;  %v527_v2 = vld [vmem:[%s1841_s4 + $0x30] sm:$0xff] }
  0x72   : > { %554 = vperm.xlu1 %1124, %v532_v3   ;;  %v528_v3 = vld [vmem:[%s1841_s4 + $0x38] sm:$0xff] }
  0x74   : > { %987 = vmatmul.mubr.msk.f32.gmra.mrb[2].mxu0 %vm411_vm0, %v384_v4 }
  0x75   : > { %500 = vmatprep.mubr.f32.mxu0 %v1341_v0  ;;  %559 = vperm.xlu0 %1123, %v533_v5  }
  0x76   : > { %564 = vperm.xlu1 %1124, %v534_v7  }
  0x78   : > { %988 = vmatmul.mubr.msk.f32.gmra.mrb[4].mxu0 %vm411_vm0, %v385_v8 }
  0x79   : > { %506 = vmatprep.mubr.f32.mxu0 %v1341_v0  ;;  %569 = vperm.xlu0 %1123, %v535_v10  }
  0x7a   : > { %574 = vperm.xlu1 %1124, %v536_v11  }
  0x7c   : > { %989 = vmatmul.mubr.msk.f32.gmra.mrb[6].mxu0 %vm411_vm0, %v386_v12 }
  0x7d   : > { %666 = vmatprep.mubr.f32.mxu0 %v1341_v0 }
  0xe4   : > { %v394_v15 = vpop.permute.xlu0 %393 }
  0xe5   : > { %v404_v27 = vpop.permute.xlu1 %403 }
  0xe8   : > { %v399_v21 = vpop.permute.xlu0 %398 }
  0xe9   : > { %v409_v43 = vpop.permute.xlu1 %408 }
  0xec   : > { %v540_v4 = vpop.permute.xlu0 %539 }
  0xed   : > { %v545_v5 = vpop.permute.xlu1 %544 }
 0x143   : > { %v490_v16 = vpop.f32.mrb[0].mxu0 }
 0x144   : > { %v492_v17 = vpop.f32.mrb[1].mxu0  ;;  %v491_v18 = vadd.f32 %v490_v16, %v394_v15 }
 0x145   : > { %v493_v22 = vadd.f32 %v492_v17, %v394_v15 }
 0x146   : > { %v513_v29 = vmax.f32 %v491_v18, 0.0 }
 0x147   : > { %v496_v23 = vpop.f32.mrb[2].mxu0  ;;  %v514_v32 = vmax.f32 %v493_v22, 0.0  ;;  %v550_v22 = vpop.permute.xlu0 %549 }
 0x148   : > { %v497_v24 = vadd.f32 %v496_v23, %v399_v21  ;;  %v498_v25 = vpop.f32.mrb[3].mxu0 }
 0x149   : > { %v499_v28 = vadd.f32 %v498_v25, %v399_v21 }
 0x14a   : > { %v515_v31 = vmax.f32 %v497_v24, 0.0 }
 0x14b   : > { %v516_v33 = vmax.f32 %v499_v28, 0.0  ;;  %v502_v36 = vpop.f32.mrb[4].mxu0 }
 0x14c   : > { %v1040_v37 = vpack.c.bf16 %v515_v31, %v513_v29  ;;  %v504_v38 = vpop.f32.mrb[5].mxu0  ;;  %v503_v42 = vadd.f32 %v502_v36, %v404_v27  ;;  %v555_v31 = vpop.permute.xlu1 %554 }
 0x14d   : > { %v1038_v39 = vpack.c.bf16 %v516_v33, %v514_v32  ;;  %v505_v44 = vadd.f32 %v504_v38, %v404_v27 }
 0x14e   : > { %v517_v51 = vmax.f32 %v503_v42, 0.0  ;;  %v560_v42 = vpop.permute.xlu0 %559 }
 0x14f   : > { %v508_v45 = vpop.f32.mrb[6].mxu0  ;;  %1039 = vmatprep.subr.bf16.mxu0 %v1038_v39  ;;  %1046 = vmatprep.subr.bf16.mxu1 %v1038_v39  ;;  %v518_v53 = vmax.f32 %v505_v44, 0.0 }
 0x150   : > { %v509_v46 = vadd.f32 %v508_v45, %v409_v43  ;;  %v510_v48 = vpop.f32.mrb[7].mxu0  ;;  %1041 = vmatpush1.bf16.msra.mxu0 %v1040_v37  ;;  %1048 = vmatpush1.bf16.msra.mxu1 %v1040_v37 }
 0x151   : > { %v511_v49 = vadd.f32 %v510_v48, %v409_v43 }
 0x152   : > { %v519_v52 = vmax.f32 %v509_v46, 0.0 }
 0x153   : > { %v520_v56 = vmax.f32 %v511_v49, 0.0 }
 0x154   : > { %v1044_v57 = vpack.c.bf16 %v519_v52, %v517_v51  ;;  %v565_v52 = vpop.permute.xlu1 %564 }
 0x155   : > { %v1042_v58 = vpack.c.bf16 %v520_v56, %v518_v53 }
 0x157   : > { %1043 = vmatprep.subr.bf16.mxu0 %v1042_v58  ;;  %1047 = vmatprep.subr.bf16.mxu1 %v1042_v58 }
 0x158   : > { %1045 = vmatpush1.bf16.msra.mxu0 %v1044_v57  ;;  %1049 = vmatpush1.bf16.msra.mxu1 %v1044_v57 }
 0x15b   : > { %990 = vmatmul.mubr.msk.f32.vlgmr.msra.gmra.mrb[8].mxu0 %vm577_vm1, %v521_v59  ;;  %991 = vmatmul.mubr.msk.f32.vlgmr.msra.gmra.mrb[0].mxu1 %vm577_vm1, %v522_v60 }
 0x15c   : > { %678 = vmatprep.mubr.f32.mxu1 %v1341_v0 }
 0x15f   : > { %992 = vmatmul.mubr.msk.f32.gmra.mrb[2].mxu1 %vm577_vm1, %v523_v61 }
 0x160   : > { %684 = vmatprep.mubr.f32.mxu1 %v1341_v0 }
 0x163   : > { %993 = vmatmul.mubr.msk.f32.gmra.mrb[4].mxu1 %vm577_vm1, %v524_v62 }
 0x164   : > { %690 = vmatprep.mubr.f32.mxu1 %v1341_v0 }
 0x167   : > { %994 = vmatmul.mubr.msk.f32.gmra.mrb[6].mxu1 %vm577_vm1, %v525_v63 }
 0x168   : > { %696 = vmatprep.mubr.f32.mxu1 %v1341_v0 }
 0x16b   : > { %995 = vmatmul.mubr.msk.f32.gmra.mrb[8].mxu1 %vm577_vm1, %v526_v1 }
 0x16c   : > { %702 = vmatprep.mubr.f32.mxu1 %v1341_v0 }
 0x16f   : > { %996 = vmatmul.mubr.msk.f32.gmra.mrb[10].mxu1 %vm577_vm1, %v527_v2 }
 0x170   : > { %708 = vmatprep.mubr.f32.mxu1 %v1341_v0 }
 0x173   : > { %997 = vmatmul.mubr.msk.f32.gmra.mrb[12].mxu1 %vm577_vm1, %v528_v3 }
 0x22e   : > { %v668_v7 = vpop.f32.mrb[8].mxu0  ;;  %v674_v8 = vpop.f32.mrb[0].mxu1 }
 0x22f   : > { %v669_v10 = vadd.f32 %v668_v7, %v540_v4  ;;  %v675_v11 = vadd.f32 %v674_v8, %v545_v5  ;;  %v670_v12 = vpop.f32.mrb[9].mxu0  ;;  %v676_v15 = vpop.f32.mrb[1].mxu1 }
 0x230   : > { %v671_v16 = vadd.f32 %v670_v12, %v540_v4  ;;  %v677_v17 = vadd.f32 %v676_v15, %v545_v5  ;;  %v570_v4 = vpop.permute.xlu0 %569 }
 0x231   : > { %v998_v18 = vmul.f32 -1.442695, %v669_v10  ;;  %v1000_v21 = vmul.f32 -1.442695, %v675_v11 }
 0x232   : > { %v999_v0 = vmul.f32 -1.442695, %v671_v16  ;;  %v1001_v23 = vmul.f32 -1.442695, %v677_v17  ;;  %v680_v24 = vpop.f32.mrb[2].mxu1 }
 0x233   : > { %1125 = vpow2.f32 %v998_v18  ;;  %v681_v25 = vadd.f32 %v680_v24, %v550_v22  ;;  %v682_v27 = vpop.f32.mrb[3].mxu1 }
 0x234   : > { %1127 = vpow2.f32 %v1000_v21  ;;  %v683_v28 = vadd.f32 %v682_v27, %v550_v22  ;;  %v575_v22 = vpop.permute.xlu1 %574 }
 0x235   : > { %1129 = vpow2.f32 %v999_v0  ;;  %v1002_v29 = vmul.f32 -1.442695, %v681_v25 }
 0x236   : > { %1131 = vpow2.f32 %v1001_v23  ;;  %v1003_v32 = vmul.f32 -1.442695, %v683_v28  ;;  %v686_v33 = vpop.f32.mrb[4].mxu1 }
 0x237   : > { %1133 = vpow2.f32 %v1002_v29  ;;  %v687_v36 = vadd.f32 %v686_v33, %v555_v31  ;;  %v688_v37 = vpop.f32.mrb[5].mxu1 }
 0x238   : > { %1135 = vpow2.f32 %v1003_v32  ;;  %v689_v38 = vadd.f32 %v688_v37, %v555_v31 }
 0x239   : > { %v1004_v39 = vmul.f32 -1.442695, %v687_v36 }
 0x23a   : > { %v1005_v43 = vmul.f32 -1.442695, %v689_v38  ;;  %v692_v44 = vpop.f32.mrb[6].mxu1 }
 0x23b   : > { %1137 = vpow2.f32 %v1004_v39  ;;  %v693_v45 = vadd.f32 %v692_v44, %v560_v42  ;;  %v694_v46 = vpop.f32.mrb[7].mxu1 }
 0x23c   : > { %1139 = vpow2.f32 %v1005_v43  ;;  %v695_v56 = vadd.f32 %v694_v46, %v560_v42 }
 0x23d   : > { %v1126_v48 = vpop.eup %1125  ;;  %v1006_v49 = vmul.f32 -1.442695, %v693_v45 }
 0x23e   : > { %v1128_v51 = vpop.eup %1127  ;;  %v763_v53 = vadd.f32 1.0, %v1126_v48  ;;  %v698_v57 = vpop.f32.mrb[8].mxu1  ;;  %v1007_v7 = vmul.f32 -1.442695, %v695_v56 }
 0x23f   : > { %v1130_v58 = vpop.eup %1129  ;;  %v765_v59 = vadd.f32 1.0, %v1128_v51  ;;  %1141 = vpow2.f32 %v1006_v49  ;;  %v699_v60 = vadd.f32 %v698_v57, %v565_v52  ;;  %v700_v61 = vpop.f32.mrb[9].mxu1 }
 0x240   : > { %v1132_v62 = vpop.eup %1131  ;;  %1143 = vrcp.f32 %v763_v53  ;;  %v764_v63 = vadd.f32 1.0, %v1130_v58  ;;  %v701_v8 = vadd.f32 %v700_v61, %v565_v52 }
 0x241   : > { %v1134_v1 = vpop.eup %1133  ;;  %1145 = vrcp.f32 %v765_v59  ;;  %v766_v2 = vadd.f32 1.0, %v1132_v62  ;;  %v1008_v12 = vmul.f32 -1.442695, %v699_v60 }
 0x242   : > { %v1136_v3 = vpop.eup %1135  ;;  %1147 = vrcp.f32 %v764_v63  ;;  %v767_v5 = vadd.f32 1.0, %v1134_v1  ;;  %v704_v10 = vpop.f32.mrb[10].mxu1  ;;  %v1009_v23 = vmul.f32 -1.442695, %v701_v8 }
 0x243   : > { %1149 = vrcp.f32 %v766_v2  ;;  %v768_v11 = vadd.f32 1.0, %v1136_v3  ;;  %v705_v15 = vadd.f32 %v704_v10, %v570_v4  ;;  %v706_v16 = vpop.f32.mrb[11].mxu1 }
 0x244   : > { %1151 = vrcp.f32 %v767_v5  ;;  %v707_v18 = vadd.f32 %v706_v16, %v570_v4 }
 0x245   : > { %v1138_v17 = vpop.eup %1137  ;;  %1153 = vrcp.f32 %v768_v11  ;;  %v1010_v27 = vmul.f32 -1.442695, %v705_v15 }
 0x246   : > { %v1140_v21 = vpop.eup %1139  ;;  %v769_v0 = vadd.f32 1.0, %v1138_v17  ;;  %1155 = vpow2.f32 %v1007_v7  ;;  %v710_v24 = vpop.f32.mrb[12].mxu1  ;;  %v1011_v33 = vmul.f32 -1.442695, %v707_v18 }
 0x247   : > { %v770_v25 = vadd.f32 1.0, %v1140_v21  ;;  %1157 = vpow2.f32 %v1008_v12  ;;  %v711_v28 = vadd.f32 %v710_v24, %v575_v22  ;;  %v712_v29 = vpop.f32.mrb[13].mxu1 }
 0x248   : > { %1159 = vrcp.f32 %v769_v0  ;;  %v713_v31 = vadd.f32 %v712_v29, %v575_v22 }
 0x249   : > { %v1142_v32 = vpop.eup %1141  ;;  %1161 = vrcp.f32 %v770_v25  ;;  %v1012_v38 = vmul.f32 -1.442695, %v711_v28 }
 0x24a   : > { %v1144_v36 = vpop.eup %1143  ;;  %v771_v37 = vadd.f32 1.0, %v1142_v32  ;;  %1163 = vpow2.f32 %v1009_v23  ;;  %v1013_v43 = vmul.f32 -1.442695, %v713_v31 }
 0x24b   : > { %v1146_v39 = vpop.eup %1145  ;;  %v811_v42 = vmul.f32 %v1144_v36, %v1585_v13  ;;  %1165 = vpow2.f32 %v1010_v27 }
 0x24c   : > { %v1148_v44 = vpop.eup %1147  ;;  %v813_v45 = vmul.f32 %v1146_v39, %v1587_v14  ;;  %1167 = vrcp.f32 %v771_v37 }
 0x24d   : > { %v1150_v46 = vpop.eup %1149  ;;  %827 = vst [vmem:[%s1749_s17] sm:$0xff] %v811_v42  ;;  %v812_v48 = vmul.f32 %v1148_v44, %v1576_v6  ;;  %1169 = vpow2.f32 %v1011_v33 }
 0x24e   : > { %v1152_v13 = vpop.eup %1151  ;;  %829 = vst [vmem:[%s1749_s17 + $0x10] sm:$0xff] %v813_v45  ;;  %v814_v49 = vmul.f32 %v1150_v46, %v1580_v9  ;;  %1171 = vpow2.f32 %v1012_v38 }
 0x24f   : > { %v1154_v14 = vpop.eup %1153  ;;  %828 = vst [vmem:[%s1749_s17 + $0x8] sm:$0xff] %v812_v48  ;;  %v815_v51 = vmul.f32 %v1152_v13, %v1604_v26  ;;  %1173 = vpow2.f32 %v1013_v43 }
 0x250   : > { %v1156_v52 = vpop.eup %1155  ;;  %830 = vst [vmem:[%s1749_s17 + $0x18] sm:$0xff] %v814_v49  ;;  %v816_v53 = vmul.f32 %v1154_v14, %v1594_v19 }
 0x251   : > { %v1158_v56 = vpop.eup %1157  ;;  %831 = vst [vmem:[%s1749_s17 + $0x20] sm:$0xff] %v815_v51  ;;  %v772_v6 = vadd.f32 1.0, %v1156_v52 }
 0x252   : > { %v1160_v57 = vpop.eup %1159  ;;  %832 = vst [vmem:[%s1749_s17 + $0x28] sm:$0xff] %v816_v53  ;;  %v773_v58 = vadd.f32 1.0, %v1158_v56 }
 0x253   : > { %v1162_v59 = vpop.eup %1161  ;;  %v817_v9 = vmul.f32 %v1160_v57, %v1610_v30  ;;  %1175 = vrcp.f32 %v772_v6 }
 0x254   : > { %v1164_v60 = vpop.eup %1163  ;;  %v818_v26 = vmul.f32 %v1162_v59, %v1596_v20  ;;  %1177 = vrcp.f32 %v773_v58 }
 0x255   : > { %v1166_v61 = vpop.eup %1165  ;;  %833 = vst [vmem:[%s1749_s17 + $0x30] sm:$0xff] %v817_v9  ;;  %v774_v62 = vadd.f32 1.0, %v1164_v60 }
 0x256   : > { %v1168_v19 = vpop.eup %1167  ;;  %834 = vst [vmem:[%s1749_s17 + $0x38] sm:$0xff] %v818_v26  ;;  %v775_v63 = vadd.f32 1.0, %v1166_v61 }
 0x257   : > { %v1170_v1 = vpop.eup %1169  ;;  %v819_v2 = vmul.f32 %v1168_v19, %v1624_v40  ;;  %1179 = vrcp.f32 %v774_v62 }
 0x258   : > { %v1172_v3 = vpop.eup %1171  ;;  %1181 = vrcp.f32 %v775_v63  ;;  %v776_v30 = vadd.f32 1.0, %v1170_v1 }
 0x259   : > { %v1174_v4 = vpop.eup %1173  ;;  %835 = vst [vmem:[%s1749_s17 + $0x40] sm:$0xff] %v819_v2  ;;  %v777_v20 = vadd.f32 1.0, %v1172_v3 }
 0x25a   : > { %1183 = vrcp.f32 %v776_v30  ;;  %v778_v5 = vadd.f32 1.0, %v1174_v4 }
 0x25b   : > { %1185 = vrcp.f32 %v777_v20 }
 0x25c   : > { %1187 = vrcp.f32 %v778_v5 }
 0x25d   : > { %v1176_v7 = vpop.eup %1175 }
 0x25e   : > { %v1178_v8 = vpop.eup %1177  ;;  %v820_v40 = vmul.f32 %v1176_v7, %v1615_v34 }
 0x25f   : > { %v821_v10 = vmul.f32 %v1178_v8, %v1626_v41 }
 0x260   : > { %836 = vst [vmem:[%s1749_s17 + $0x48] sm:$0xff] %v820_v40 }
 0x261   : > { %v1180_v11 = vpop.eup %1179  ;;  %837 = vst [vmem:[%s1749_s17 + $0x50] sm:$0xff] %v821_v10 }
 0x262   : > { %v1182_v12 = vpop.eup %1181  ;;  %v822_v15 = vmul.f32 %v1180_v11, %v1617_v35 }
 0x263   : > { %v823_v16 = vmul.f32 %v1182_v12, %v1644_v54 }
 0x264   : > { %v1184_v17 = vpop.eup %1183  ;;  %838 = vst [vmem:[%s1749_s17 + $0x58] sm:$0xff] %v822_v15 }
 0x265   : > { %v1186_v34 = vpop.eup %1185  ;;  %839 = vst [vmem:[%s1749_s17 + $0x60] sm:$0xff] %v823_v16  ;;  %v824_v41 = vmul.f32 %v1184_v17, %v1634_v47 }
 0x266   : > { %v1188_v18 = vpop.eup %1187  ;;  %v825_v21 = vmul.f32 %v1186_v34, %v1646_v55 }
 0x267   : > { %840 = vst [vmem:[%s1749_s17 + $0x68] sm:$0xff] %v824_v41  ;;  %v826_v35 = vmul.f32 %v1188_v18, %v1638_v50 }
 0x268   : > { %841 = vst [vmem:[%s1749_s17 + $0x70] sm:$0xff] %v825_v21 }
 0x269   : > { %842 = vst [vmem:[%s1749_s17 + $0x78] sm:$0xff] %v826_v35 }
 0x26a   : > { %1262 = shalt.err (!%p1259_p11)
}
 0x26b   : > { %s1263_s7 = scalar_lea.hbm %s1782_s27, 2048  ;;  %s1267_s18 = scalar_lea.hbm %s1843_s6, 4096 }
 0x26c   : > { %p1264_p1 = scmp.ne.s32.totalorder %s1782_s27, %s1263_s7  ;;  %p1268_p5 = scmp.lt.u32.totalorder %s1782_s27, %s1843_s6 }
 0x26d   : > { %p1269_p4 = scmp.lt.u32.totalorder %s1267_s18, %s1263_s7  ;;  %p1271_p0 = scmp.lt.u32.totalorder %s1263_s7, %s1782_s27 }
 0x26e   : > { %p1265_p6 = pnand %p1264_p1, %p1862_p3 }
 0x26f   : > { %p1270_p8 = por %p1269_p4, %p1268_p5 }
 0x270   : > { %p1266_p2 = pneg %p1265_p6 }
 0x271   : > { %p1272_p12 = por %p1271_p0, %p1270_p8 }
 0x273   : > { %p1273_p13 = pnand %p1272_p12, %p1266_p2 }
 0x275   : > { %1276 = shalt.err (!%p1273_p13)
}
 0x276   : > { %s1344_s14 = smov 256   ;;  %s1345_s30 = smov 16  }
 0x277   : > { %1054 = dma.vmem_to_hbm [thread:$0]  (%p1862_p3), %s1784_s15, 2048, %s1782_s27, %s844_s24, %s1344_s14, %s1344_s14, %s1345_s30  }
 0x278 PF: > { %s874_s20 = sand.u32 1, %s1315_s21   ;;  %p1863_p7 = scmp.ne.s32.totalorder %s1854_s12, 0 }
 0x279   : > { %p1864_p10 = scmp.ge.s32.totalorder %s1335_s26, 2  ;;  %s875_s19 = scalar_lea.sflag [#allocation4], %s874_s20 }
 0x27b   : > { %p1064_p9 = pnand %p1864_p10, %p1863_p7 }
 0x27d   : > { %1310 = dma.done.wait (!%p1064_p9), %s875_s19, 2048  }
 0x27e   : > { %1312 = vsyncadd (!%p1064_p9), %s875_s19, 4294965248  ;;  %s25_s26 = sadd.s32 1, %s1335_s26   ;;  %s1865_s10 = sld [smem:[#allocation11_spill]] }
 0x27f   : > { %p22_p11 = scmp.ge.s32.totalorder %s25_s26, 4   ;;  %s1866_s21 = smov %s1319_s22 }
 0x280   : > { %s1867_s22 = smov %s1323_s23  ;;  %s1868_s23 = smov %s1437_s11 }
 0x281   : > { %s1869_s24 = smov %s1331_s25  ;;  %24 = sbr.rel (!%p22_p11) target bundleno = 10 (0xa), region = 102 }
 0x284   : > { %s1870_s25 = smov %s1865_s10 }
 0x288   :  { %880 = vsyncpa [#allocation3], 1 }
 0x289   :  { %882 = vsyncpa [#allocation3 + $0x1], 1 }
 0x28a   :  { %883 = vsyncpa [#allocation6], 1 }
 0x28b   :  { %885 = vsyncpa [#allocation6 + $0x1], 1 }
 0x28c   :  { %886 = vsyncpa [#allocation4], 1 }
 0x28d   :  { %888 = vsyncpa [#allocation4 + $0x1], 1 }

</bundles_post_ra>
